<compile_context>
chip_gen: v5e
topology: v5e:2x2
jax: 0.10.0
libtpu: 0.0.40
codegen_flags: <defaults>
</compile_context>

<pallas_src>
import jax
import jax.numpy as jnp
from jax.experimental import pallas as pl
from jax.experimental.pallas import tpu as pltpu


def _round_up(v, m):
    return (v + m - 1) // m * m


def mlp_kernel(x_ref,
               w1_ref, b1_ref,
               w2_ref, b2_ref,
               w3_ref, b3_ref,
               w4_ref, b4_ref,
               o_ref):
    """One batch tile. Batch is on the lane axis throughout.

    x_ref  : (d_in,  T)       bf16
    wK_ref : (dK_out, dK_in)  bf16   (PyTorch (out, in) layout, zero-padded)
    bK_ref : (dK_out, 1)      f32
    w4_ref : (d3_pad, 1)      f32
    b4_ref : (1, 1)           f32
    o_ref  : (1, T)           f32    (lane-dense output slab)
    """
    # Layers 1-3: bf16 MXU matmuls, f32 accumulation; bias + ReLU on the VPU.
    h = jnp.dot(w1_ref[...], x_ref[...], preferred_element_type=jnp.float32)
    h = jnp.maximum(h + b1_ref[...], 0.0)
    h = jnp.dot(w2_ref[...], h.astype(jnp.bfloat16),
                preferred_element_type=jnp.float32)
    h = jnp.maximum(h + b2_ref[...], 0.0)
    h = jnp.dot(w3_ref[...], h.astype(jnp.bfloat16),
                preferred_element_type=jnp.float32)
    h = jnp.maximum(h + b3_ref[...], 0.0)
    # Layer 4 (K x 1): keep it off the MXU -- VPU multiply + sublane reduce.
    z = jnp.sum(h * w4_ref[...], axis=0, keepdims=True) + b4_ref[...]
    o_ref[...] = jax.nn.sigmoid(z).astype(o_ref.dtype)


def init_params(key, input_size, first_layer=100, second_layer=100,
                third_layer=200, output_size=1):
    """Logical params in native nn.Linear layout: w (out, in), b (out,)."""
    dims = [(first_layer, input_size),
            (second_layer, first_layer),
            (third_layer, second_layer),
            (output_size, third_layer)]
    params = {}
    for idx, (dout, din) in enumerate(dims, start=1):
        key, kw, kb = jax.random.split(key, 3)
        bound = 1.0 / (din ** 0.5)  # matches nn.Linear default init range
        params[f"w{idx}"] = jax.random.uniform(
            kw, (dout, din), jnp.float32, -bound, bound)
        params[f"b{idx}"] = jax.random.uniform(
            kb, (dout,), jnp.float32, -bound, bound)
    return params


def pack_params(params):
    """Pad hidden widths to multiples of 128, reshape to the kernel layout and
    cast MXU operands to bf16. Do this once, outside the forward pass."""
    h1, d_in = params["w1"].shape
    h2 = params["w2"].shape[0]
    h3 = params["w3"].shape[0]
    n_out = params["w4"].shape[0]
    assert n_out == 1, "VPU final-layer path assumes output_size == 1"

    p1, p2, p3 = _round_up(h1, 128), _round_up(h2, 128), _round_up(h3, 128)

    def pad2(w, r, c):
        return jnp.pad(w, ((0, r - w.shape[0]), (0, c - w.shape[1])))

    def padb(b, r):
        return jnp.pad(b, (0, r - b.shape[0])).reshape(r, 1).astype(jnp.float32)

    return {
        "w1": pad2(params["w1"], p1, d_in).astype(jnp.bfloat16),
        "b1": padb(params["b1"], p1),
        "w2": pad2(params["w2"], p2, p1).astype(jnp.bfloat16),
        "b2": padb(params["b2"], p2),
        "w3": pad2(params["w3"], p3, p2).astype(jnp.bfloat16),
        "b3": padb(params["b3"], p3),
        # Final layer stays f32 on the VPU path: (p3, 1) column + scalar bias.
        "w4": pad2(params["w4"], 1, p3).T.astype(jnp.float32),
        "b4": params["b4"].reshape(1, 1).astype(jnp.float32),
    }


def array_feature_net(x, packed, *, batch_tile=None):
    """Fused forward pass. x: (B, input_size) f32. packed: pack_params(...)."""
    B, d_in = x.shape
    assert packed["w1"].shape[1] == d_in

    if batch_tile is None:
        # 512 amortizes the ~0.35us/step grid overhead, is a multiple of 256
        # (v6e/v7x MXU width), gives >=2 grid steps once B > 512 (so the
        # "parallel" axis shards across v7x's two TensorCores), and keeps the
        # per-step VMEM footprint (~2 MiB) far below every generation's
        # scoped-VMEM default (v5e 16 MiB / v6e-v7x 32 MiB).
        batch_tile = _round_up(B, 128) if B <= 512 else 512
    assert batch_tile % 128 == 0, "batch_tile must be a multiple of 128"

    B_pad = _round_up(B, batch_tile)
    num_tiles = B_pad // batch_tile

    # Transpose + zero-pad the batch onto the lane axis; bf16 halves x DMA bytes.
    x_t = jnp.pad(x.T, ((0, 0), (0, B_pad - B))).astype(jnp.bfloat16)

    def const_spec(arr):
        # Grid-invariant weights/biases: single buffer, DMA'd once.
        return pl.BlockSpec(arr.shape, lambda i: (0, 0),
                            pipeline_mode=pl.Buffered(1))

    names = ("w1", "b1", "w2", "b2", "w3", "b3", "w4", "b4")
    in_specs = [pl.BlockSpec((d_in, batch_tile), lambda i: (0, i))]
    in_specs += [const_spec(packed[n]) for n in names]
    args = [x_t] + [packed[n] for n in names]

    out = pl.pallas_call(
        mlp_kernel,
        out_shape=jax.ShapeDtypeStruct((1, B_pad), jnp.float32),
        grid=(num_tiles,),
        in_specs=in_specs,
        out_specs=pl.BlockSpec((1, batch_tile), lambda i: (0, i)),
        compiler_params=pltpu.CompilerParams(
            dimension_semantics=("parallel",)),
    )(*args)

    # Lane-dense (1, B_pad) slab -> logical (B, 1).
    return out[0, :B].reshape(B, 1)


def reference_forward(x, params):
    h = jnp.maximum(x @ params["w1"].T + params["b1"], 0.0)
    h = jnp.maximum(h @ params["w2"].T + params["b2"], 0.0)
    h = jnp.maximum(h @ params["w3"].T + params["b3"], 0.0)
    return jax.nn.sigmoid(h @ params["w4"].T + params["b4"])


if __name__ == "__main__":
    key = jax.random.PRNGKey(0)
    key, kx, kx2 = jax.random.split(key, 3)

    input_size = 32
    params = init_params(key, input_size)
    packed = pack_params(params)

    # Small smoke test (module-scale shapes).
    batch = 8
    x = jax.random.normal(kx, (batch, input_size), jnp.float32)
    out = jax.block_until_ready(array_feature_net(x, packed))
    ref = reference_forward(x, params)
    assert out.shape == (batch, 1)
    # bf16 operands with f32 accumulation -> loosened tolerance.
    assert jnp.allclose(out, ref, atol=2e-2, rtol=2e-2), (
        f"mismatch: max|d|={float(jnp.max(jnp.abs(out - ref)))}")

    # Larger batch exercises the multi-tile pipelined / megacore path.
    batch2 = 1024
    x2 = jax.random.normal(kx2, (batch2, input_size), jnp.float32)
    out2 = jax.block_until_ready(array_feature_net(x2, packed))
    ref2 = reference_forward(x2, params)
    assert out2.shape == (batch2, 1)
    assert jnp.allclose(out2, ref2, atol=2e-2, rtol=2e-2), (
        f"mismatch: max|d|={float(jnp.max(jnp.abs(out2 - ref2)))}")

    print("KERNEL_OK")
</pallas_src>

<mosaic_0001>
module attributes {stable_mosaic.version = 11 : i64} {
  func.func @mlp_kernel(%arg0: i32, %arg1: memref<32x128xbf16, #tpu.memory_space<vmem>>, %arg2: memref<128x32xbf16, #tpu.memory_space<vmem>>, %arg3: memref<128x1xf32, #tpu.memory_space<vmem>>, %arg4: memref<128x128xbf16, #tpu.memory_space<vmem>>, %arg5: memref<128x1xf32, #tpu.memory_space<vmem>>, %arg6: memref<256x128xbf16, #tpu.memory_space<vmem>>, %arg7: memref<256x1xf32, #tpu.memory_space<vmem>>, %arg8: memref<256x1xf32, #tpu.memory_space<vmem>>, %arg9: memref<1x1xf32, #tpu.memory_space<vmem>>, %arg10: memref<1x128xf32, #tpu.memory_space<vmem>>) attributes {dimension_semantics = [#tpu.dimension_semantics<parallel>], iteration_bounds = array<i64: 1>, scalar_prefetch = 0 : i64, scratch_operands = 0 : i64, tpu.core_type = #tpu.core_type<tc>, window_params = [{transform_indices = @transform_0, window_bounds = array<i64: 32, 128>}, {pipeline_mode = #tpu.pipeline_mode<synchronous>, transform_indices = @transform_1, window_bounds = array<i64: 128, 32>}, {pipeline_mode = #tpu.pipeline_mode<synchronous>, transform_indices = @transform_2, window_bounds = array<i64: 128, 1>}, {pipeline_mode = #tpu.pipeline_mode<synchronous>, transform_indices = @transform_3, window_bounds = array<i64: 128, 128>}, {pipeline_mode = #tpu.pipeline_mode<synchronous>, transform_indices = @transform_4, window_bounds = array<i64: 128, 1>}, {pipeline_mode = #tpu.pipeline_mode<synchronous>, transform_indices = @transform_5, window_bounds = array<i64: 256, 128>}, {pipeline_mode = #tpu.pipeline_mode<synchronous>, transform_indices = @transform_6, window_bounds = array<i64: 256, 1>}, {pipeline_mode = #tpu.pipeline_mode<synchronous>, transform_indices = @transform_7, window_bounds = array<i64: 256, 1>}, {pipeline_mode = #tpu.pipeline_mode<synchronous>, transform_indices = @transform_8, window_bounds = array<i64: 1, 1>}, {transform_indices = @transform_9, window_bounds = array<i64: 1, 128>}]} {
    %c0 = arith.constant 0 : index
    %c0_0 = arith.constant 0 : index
    %0 = vector.load %arg2[%c0, %c0_0] : memref<128x32xbf16, #tpu.memory_space<vmem>>, vector<128x32xbf16>
    %c0_1 = arith.constant 0 : index
    %c0_2 = arith.constant 0 : index
    %1 = vector.load %arg1[%c0_1, %c0_2] : memref<32x128xbf16, #tpu.memory_space<vmem>>, vector<32x128xbf16>
    %cst = arith.constant dense<0.000000e+00> : vector<128x128xf32>
    %2 = tpu.matmul %0, %1, %cst {dimension_numbers = #tpu.dot_dimension_numbers<[1], [0], [0], [1], [0, 0, 1, 1], [], []>} : vector<128x32xbf16>, vector<32x128xbf16>, vector<128x128xf32> -> vector<128x128xf32>
    %c0_3 = arith.constant 0 : index
    %c0_4 = arith.constant 0 : index
    %3 = vector.load %arg3[%c0_3, %c0_4] : memref<128x1xf32, #tpu.memory_space<vmem>>, vector<128x1xf32>
    %4 = vector.broadcast %3 : vector<128x1xf32> to vector<128x128xf32>
    %5 = arith.addf %2, %4 : vector<128x128xf32>
    %cst_5 = arith.constant 0.000000e+00 : f32
    %6 = vector.broadcast %cst_5 : f32 to vector<128x128xf32>
    %7 = arith.maximumf %5, %6 : vector<128x128xf32>
    %c0_6 = arith.constant 0 : index
    %c0_7 = arith.constant 0 : index
    %8 = vector.load %arg4[%c0_6, %c0_7] : memref<128x128xbf16, #tpu.memory_space<vmem>>, vector<128x128xbf16>
    %9 = arith.truncf %7 : vector<128x128xf32> to vector<128x128xbf16>
    %cst_8 = arith.constant dense<0.000000e+00> : vector<128x128xf32>
    %10 = tpu.matmul %8, %9, %cst_8 {dimension_numbers = #tpu.dot_dimension_numbers<[1], [0], [0], [1], [0, 0, 1, 1], [], []>} : vector<128x128xbf16>, vector<128x128xbf16>, vector<128x128xf32> -> vector<128x128xf32>
    %c0_9 = arith.constant 0 : index
    %c0_10 = arith.constant 0 : index
    %11 = vector.load %arg5[%c0_9, %c0_10] : memref<128x1xf32, #tpu.memory_space<vmem>>, vector<128x1xf32>
    %12 = vector.broadcast %11 : vector<128x1xf32> to vector<128x128xf32>
    %13 = arith.addf %10, %12 : vector<128x128xf32>
    %cst_11 = arith.constant 0.000000e+00 : f32
    %14 = vector.broadcast %cst_11 : f32 to vector<128x128xf32>
    %15 = arith.maximumf %13, %14 : vector<128x128xf32>
    %c0_12 = arith.constant 0 : index
    %c0_13 = arith.constant 0 : index
    %16 = vector.load %arg6[%c0_12, %c0_13] : memref<256x128xbf16, #tpu.memory_space<vmem>>, vector<256x128xbf16>
    %17 = arith.truncf %15 : vector<128x128xf32> to vector<128x128xbf16>
    %cst_14 = arith.constant dense<0.000000e+00> : vector<256x128xf32>
    %18 = tpu.matmul %16, %17, %cst_14 {dimension_numbers = #tpu.dot_dimension_numbers<[1], [0], [0], [1], [0, 0, 1, 1], [], []>} : vector<256x128xbf16>, vector<128x128xbf16>, vector<256x128xf32> -> vector<256x128xf32>
    %c0_15 = arith.constant 0 : index
    %c0_16 = arith.constant 0 : index
    %19 = vector.load %arg7[%c0_15, %c0_16] : memref<256x1xf32, #tpu.memory_space<vmem>>, vector<256x1xf32>
    %20 = vector.broadcast %19 : vector<256x1xf32> to vector<256x128xf32>
    %21 = arith.addf %18, %20 : vector<256x128xf32>
    %cst_17 = arith.constant 0.000000e+00 : f32
    %22 = vector.broadcast %cst_17 : f32 to vector<256x128xf32>
    %23 = arith.maximumf %21, %22 : vector<256x128xf32>
    %c0_18 = arith.constant 0 : index
    %c0_19 = arith.constant 0 : index
    %24 = vector.load %arg8[%c0_18, %c0_19] : memref<256x1xf32, #tpu.memory_space<vmem>>, vector<256x1xf32>
    %25 = vector.broadcast %24 : vector<256x1xf32> to vector<256x128xf32>
    %26 = arith.mulf %23, %25 : vector<256x128xf32>
    %cst_20 = arith.constant dense<0.000000e+00> : vector<128xf32>
    %27 = vector.multi_reduction <add>, %26, %cst_20 [0] : vector<256x128xf32> to vector<128xf32>
    %28 = vector.shape_cast %27 : vector<128xf32> to vector<1x128xf32>
    %c0_21 = arith.constant 0 : index
    %c0_22 = arith.constant 0 : index
    %29 = vector.load %arg9[%c0_21, %c0_22] : memref<1x1xf32, #tpu.memory_space<vmem>>, vector<1x1xf32>
    %30 = vector.broadcast %29 : vector<1x1xf32> to vector<1x128xf32>
    %31 = arith.addf %28, %30 : vector<1x128xf32>
    %32 = arith.negf %31 : vector<1x128xf32>
    %33 = math.exp %32 : vector<1x128xf32>
    %cst_23 = arith.constant 1.000000e+00 : f32
    %34 = vector.broadcast %cst_23 : f32 to vector<1x128xf32>
    %35 = arith.addf %34, %33 : vector<1x128xf32>
    %36 = arith.divf %34, %35 : vector<1x128xf32>
    %c0_24 = arith.constant 0 : index
    %c0_25 = arith.constant 0 : index
    %37 = vector.load %arg10[%c0_24, %c0_25] : memref<1x128xf32, #tpu.memory_space<vmem>>, vector<1x128xf32>
    tpu.vector_store %arg10[%c0_24, %c0_25], %36 {strides = array<i32>} : memref<1x128xf32, #tpu.memory_space<vmem>>, vector<1x128xf32>,
    return
  }
  func.func @transform_0(%arg0: i32) -> (i32, i32) {
    %c0_i32 = arith.constant 0 : i32
    %c0_i32_0 = arith.constant 0 : i32
    return %c0_i32, %arg0 : i32, i32
  }
  func.func @transform_1(%arg0: i32) -> (i32, i32) {
    %c0_i32 = arith.constant 0 : i32
    %c0_i32_0 = arith.constant 0 : i32
    %c0_i32_1 = arith.constant 0 : i32
    return %c0_i32, %c0_i32_0 : i32, i32
  }
  func.func @transform_2(%arg0: i32) -> (i32, i32) {
    %c0_i32 = arith.constant 0 : i32
    %c0_i32_0 = arith.constant 0 : i32
    %c0_i32_1 = arith.constant 0 : i32
    return %c0_i32, %c0_i32_0 : i32, i32
  }
  func.func @transform_3(%arg0: i32) -> (i32, i32) {
    %c0_i32 = arith.constant 0 : i32
    %c0_i32_0 = arith.constant 0 : i32
    %c0_i32_1 = arith.constant 0 : i32
    return %c0_i32, %c0_i32_0 : i32, i32
  }
  func.func @transform_4(%arg0: i32) -> (i32, i32) {
    %c0_i32 = arith.constant 0 : i32
    %c0_i32_0 = arith.constant 0 : i32
    %c0_i32_1 = arith.constant 0 : i32
    return %c0_i32, %c0_i32_0 : i32, i32
  }
  func.func @transform_5(%arg0: i32) -> (i32, i32) {
    %c0_i32 = arith.constant 0 : i32
    %c0_i32_0 = arith.constant 0 : i32
    %c0_i32_1 = arith.constant 0 : i32
    return %c0_i32, %c0_i32_0 : i32, i32
  }
  func.func @transform_6(%arg0: i32) -> (i32, i32) {
    %c0_i32 = arith.constant 0 : i32
    %c0_i32_0 = arith.constant 0 : i32
    %c0_i32_1 = arith.constant 0 : i32
    return %c0_i32, %c0_i32_0 : i32, i32
  }
  func.func @transform_7(%arg0: i32) -> (i32, i32) {
    %c0_i32 = arith.constant 0 : i32
    %c0_i32_0 = arith.constant 0 : i32
    %c0_i32_1 = arith.constant 0 : i32
    return %c0_i32, %c0_i32_0 : i32, i32
  }
  func.func @transform_8(%arg0: i32) -> (i32, i32) {
    %c0_i32 = arith.constant 0 : i32
    %c0_i32_0 = arith.constant 0 : i32
    %c0_i32_1 = arith.constant 0 : i32
    return %c0_i32, %c0_i32_0 : i32, i32
  }
  func.func @transform_9(%arg0: i32) -> (i32, i32) {
    %c0_i32 = arith.constant 0 : i32
    %c0_i32_0 = arith.constant 0 : i32
    return %c0_i32, %arg0 : i32, i32
  }
}

</mosaic_0001>

<bundles_post_ra>
// kernel: tpu_custom_call.1
= control target key start
LH: loop header
LB: loop body
LE: loop exit
PB: predicated region body
PF: predicated region fallthrough
CT: control target
= control target key end

     0   :  { %s2141_s0 = inlined_call_operand.vmem [shape: bf16[32,128], index: 0, kind: input, shape index: {}]   ;;  %s2142_s1 = inlined_call_operand.vmem [shape: bf16[128,32], index: 1, kind: input, shape index: {}]   ;;  %s2143_s2 = inlined_call_operand.vmem [shape: f32[128,1], index: 2, kind: input, shape index: {}]   ;;  %s2144_s3 = inlined_call_operand.vmem [shape: bf16[128,128], index: 3, kind: input, shape index: {}]   ;;  %s2145_s4 = inlined_call_operand.vmem [shape: f32[128,1], index: 4, kind: input, shape index: {}]   ;;  %s2146_s5 = inlined_call_operand.vmem [shape: bf16[256,128], index: 5, kind: input, shape index: {}]   ;;  %s2147_s6 = inlined_call_operand.vmem [shape: f32[256,1], index: 6, kind: input, shape index: {}]   ;;  %s2148_s7 = inlined_call_operand.vmem [shape: f32[256,1], index: 7, kind: input, shape index: {}]   ;;  %s2149_s8 = inlined_call_operand.<no memory space> [shape: f32[1,1], index: 8, kind: input, shape index: {}]   ;;  %s2150_s9 = inlined_call_operand.hbm [shape: f32[1,128], index: 9, kind: output, shape index: {}]  }
   0x1   :  { %v14_v0 = vstv %s2149_s8 }
   0x2   :  { %15 = vst [vmem:[#allocation2] sm:$0x1] %v14_v0 }
   0x3   :  { %v70_v1 = vld [vmem:[%s2143_s2 + $0x70] sm:$0xff]  ;;  %v68_v2 = vld [vmem:[%s2143_s2 + $0x60] sm:$0xff]  ;;  %v1503_v4 = vmov 0   ;;  %v1435_v5 = vld [vmem:[%s2141_s0 + $0x8] sm:$0xff] }
   0x4   :  { %v66_v3 = vld [vmem:[%s2143_s2 + $0x50] sm:$0xff]  ;;  %1472 = vset.pattern.permute.xlu2 %v1503_v4  ;;  %1471 = vset.pattern.permute.xlu1 %v1503_v4  ;;  %v1434_v6 = vld [vmem:[%s2141_s0] sm:$0xff] }
   0x5   :  { %1470 = vset.pattern.permute.xlu0 %v1503_v4  ;;  %134 = vperm.xlu1 %1471, %v68_v2  }
   0x6   :  { %144 = vperm.xlu0 %1470, %v70_v1   ;;  %124 = vperm.xlu2 %1472, %v66_v3  }
   0x7   :  { %235 = vmatpush.bf16.msra.mxu0 %v1435_v5 }
   0x8   :  { %16 = vsyncpa [#allocation4], 0  ;;  %v69_v7 = vld [vmem:[%s2143_s2 + $0x68] sm:$0xff]  ;;  %v71_v8 = vld [vmem:[%s2143_s2 + $0x78] sm:$0xff]  ;;  %vm204_vm0 = vcmask 261120  }
   0x9   :  { %v67_v9 = vld [vmem:[%s2143_s2 + $0x58] sm:$0xff]  ;;  %v1426_v10 = vld [vmem:[%s2142_s1] sm:$0xff]  ;;  %v65_v11 = vld [vmem:[%s2143_s2 + $0x48] sm:$0xff] }
   0xa   :  { %v64_v12 = vld [vmem:[%s2143_s2 + $0x40] sm:$0xff]  ;;  %v62_v13 = vld [vmem:[%s2143_s2 + $0x30] sm:$0xff]  ;;  %v63_v15 = vld [vmem:[%s2143_s2 + $0x38] sm:$0xff] }
   0xb   :  { %236 = vmatpush.bf16.msra.mxu0 %v1434_v6  ;;  %v60_v14 = vld [vmem:[%s2143_s2 + $0x20] sm:$0xff]  ;;  %v61_v16 = vld [vmem:[%s2143_s2 + $0x28] sm:$0xff]  ;;  %v59_v18 = vld [vmem:[%s2143_s2 + $0x18] sm:$0xff] }
   0xc   :  { %v1427_v17 = vld [vmem:[%s2142_s1 + $0x8] sm:$0xff]  ;;  %v58_v19 = vld [vmem:[%s2143_s2 + $0x10] sm:$0xff]  ;;  %v56_v20 = vld [vmem:[%s2143_s2] sm:$0xff] }
   0xd   :  { %139 = vperm.xlu1 %1471, %v69_v7   ;;  %v318_v21 = vld [vmem:[%s2145_s4] sm:$0xff]  ;;  %v57_v22 = vld [vmem:[%s2143_s2 + $0x8] sm:$0xff]  ;;  %v1428_v24 = vld [vmem:[%s2142_s1 + $0x10] sm:$0xff]  ;;  %s1272_s2 = sshll.u32 %s2150_s9, 4  ;;  %s1273_s2 = int_to_ptr.hbm [resolvable:$true] %s1272_s2 }
   0xe   :  { %149 = vperm.xlu0 %1470, %v71_v8   ;;  %129 = vperm.xlu2 %1472, %v67_v9   ;;  %v319_v23 = vld [vmem:[%s2145_s4 + $0x8] sm:$0xff]  ;;  %v321_v25 = vld [vmem:[%s2145_s4 + $0x18] sm:$0xff]  ;;  %v320_v26 = vld [vmem:[%s2145_s4 + $0x10] sm:$0xff] }
   0xf   :  { %1321 = vmatmul.msk.bf16.vlgmr.msra.gmra.mxu0 %vm204_vm0, %v1426_v10  ;;  %v322_v27 = vld [vmem:[%s2145_s4 + $0x20] sm:$0xff]  ;;  %v324_v28 = vld [vmem:[%s2145_s4 + $0x30] sm:$0xff]  ;;  %v323_v29 = vld [vmem:[%s2145_s4 + $0x28] sm:$0xff] }
  0x10   :  { %v325_v30 = vld [vmem:[%s2145_s4 + $0x38] sm:$0xff]  ;;  %v327_v32 = vld [vmem:[%s2145_s4 + $0x48] sm:$0xff]  ;;  %v326_v33 = vld [vmem:[%s2145_s4 + $0x40] sm:$0xff] }
  0x11   :  { %v1429_v31 = vld [vmem:[%s2142_s1 + $0x18] sm:$0xff]  ;;  %v328_v34 = vld [vmem:[%s2145_s4 + $0x50] sm:$0xff]  ;;  %v330_v35 = vld [vmem:[%s2145_s4 + $0x60] sm:$0xff] }
  0x12   :  { %v329_v36 = vld [vmem:[%s2145_s4 + $0x58] sm:$0xff]  ;;  %v332_v37 = vld [vmem:[%s2145_s4 + $0x70] sm:$0xff]  ;;  %v1430_v38 = vld [vmem:[%s2142_s1 + $0x20] sm:$0xff] }
  0x13   :  { %v331_v39 = vld [vmem:[%s2145_s4 + $0x68] sm:$0xff]  ;;  %v333_v40 = vld [vmem:[%s2145_s4 + $0x78] sm:$0xff]  ;;  %v567_v41 = vld [vmem:[%s2147_s6] sm:$0xff] }
  0x14   :  { %v569_v42 = vld [vmem:[%s2147_s6 + $0x10] sm:$0xff]  ;;  %v568_v43 = vld [vmem:[%s2147_s6 + $0x8] sm:$0xff]  ;;  %v570_v44 = vld [vmem:[%s2147_s6 + $0x18] sm:$0xff] }
  0x15   :  { %119 = vperm.xlu1 %1471, %v65_v11   ;;  %v1431_v45 = vld [vmem:[%s2142_s1 + $0x28] sm:$0xff]  ;;  %v571_v47 = vld [vmem:[%s2147_s6 + $0x20] sm:$0xff]  ;;  %v573_v48 = vld [vmem:[%s2147_s6 + $0x30] sm:$0xff] }
  0x16   :  { %114 = vperm.xlu0 %1470, %v64_v12   ;;  %104 = vperm.xlu2 %1472, %v62_v13   ;;  %v572_v46 = vld [vmem:[%s2147_s6 + $0x28] sm:$0xff]  ;;  %v575_v49 = vld [vmem:[%s2147_s6 + $0x40] sm:$0xff]  ;;  %v574_v50 = vld [vmem:[%s2147_s6 + $0x38] sm:$0xff] }
  0x17   :  { %v576_v51 = vld [vmem:[%s2147_s6 + $0x48] sm:$0xff]  ;;  %v1432_v52 = vld [vmem:[%s2142_s1 + $0x30] sm:$0xff]  ;;  %v578_v53 = vld [vmem:[%s2147_s6 + $0x58] sm:$0xff] }
  0x18   :  { %v577_v54 = vld [vmem:[%s2147_s6 + $0x50] sm:$0xff]  ;;  %v579_v55 = vld [vmem:[%s2147_s6 + $0x60] sm:$0xff]  ;;  %v580_v59 = vld [vmem:[%s2147_s6 + $0x68] sm:$0xff] }
  0x19   :  { %v581_v58 = vld [vmem:[%s2147_s6 + $0x70] sm:$0xff]  ;;  %v582_v60 = vld [vmem:[%s2147_s6 + $0x78] sm:$0xff]  ;;  %v584_v1 = vld [vmem:[%s2147_s6 + $0x88] sm:$0xff] }
  0x1a   :  { %v1433_v61 = vld [vmem:[%s2142_s1 + $0x38] sm:$0xff]  ;;  %v583_v2 = vld [vmem:[%s2147_s6 + $0x80] sm:$0xff]  ;;  %v585_v3 = vld [vmem:[%s2147_s6 + $0x90] sm:$0xff] }
  0x1b   :  { %v587_v7 = vld [vmem:[%s2147_s6 + $0xa0] sm:$0xff]  ;;  %v586_v8 = vld [vmem:[%s2147_s6 + $0x98] sm:$0xff]  ;;  %v588_v9 = vld [vmem:[%s2147_s6 + $0xa8] sm:$0xff] }
  0x1c   :  { %v590_v13 = vld [vmem:[%s2147_s6 + $0xb8] sm:$0xff] }
  0x1d   :  { %94 = vperm.xlu1 %1471, %v60_v14   ;;  %v589_v14 = vld [vmem:[%s2147_s6 + $0xb0] sm:$0xff] }
  0x1e   :  { %109 = vperm.xlu0 %1470, %v63_v15   ;;  %99 = vperm.xlu2 %1472, %v61_v16   ;;  %v591_v15 = vld [vmem:[%s2147_s6 + $0xc0] sm:$0xff] }
  0x1f   :  { %1322 = vmatmul.msk.bf16.gmra.mxu0 %vm204_vm0, %v1427_v17 }
  0x25   :  { %89 = vperm.xlu1 %1471, %v59_v18  }
  0x26   :  { %84 = vperm.xlu0 %1470, %v58_v19   ;;  %74 = vperm.xlu2 %1472, %v56_v20   ;;  %v593_v20 = vld [vmem:[%s2147_s6 + $0xd0] sm:$0xff] }
  0x2d   :  { %336 = vperm.xlu1 %1471, %v318_v21   ;;  %v592_v21 = vld [vmem:[%s2147_s6 + $0xc8] sm:$0xff] }
  0x2e   :  { %79 = vperm.xlu0 %1470, %v57_v22   ;;  %341 = vperm.xlu2 %1472, %v319_v23   ;;  %v594_v22 = vld [vmem:[%s2147_s6 + $0xd8] sm:$0xff] }
  0x2f   :  { %1323 = vmatmul.msk.bf16.gmra.mxu0 %vm204_vm0, %v1428_v24 }
  0x35   :  { %351 = vperm.xlu1 %1471, %v321_v25  }
  0x36   :  { %346 = vperm.xlu0 %1470, %v320_v26   ;;  %356 = vperm.xlu2 %1472, %v322_v27  }
  0x3d   :  { %366 = vperm.xlu1 %1471, %v324_v28   ;;  %v596_v28 = vld [vmem:[%s2147_s6 + $0xe8] sm:$0xff] }
  0x3e   :  { %361 = vperm.xlu0 %1470, %v323_v29   ;;  %371 = vperm.xlu2 %1472, %v325_v30  }
  0x3f   :  { %1324 = vmatmul.msk.bf16.gmra.mxu0 %vm204_vm0, %v1429_v31 }
  0x45   :  { %381 = vperm.xlu1 %1471, %v327_v32   ;;  %v595_v32 = vld [vmem:[%s2147_s6 + $0xe0] sm:$0xff] }
  0x46   :  { %376 = vperm.xlu0 %1470, %v326_v33   ;;  %386 = vperm.xlu2 %1472, %v328_v34   ;;  %v597_v33 = vld [vmem:[%s2147_s6 + $0xf0] sm:$0xff] }
  0x4d   :  { %396 = vperm.xlu1 %1471, %v330_v35  }
  0x4e   :  { %391 = vperm.xlu0 %1470, %v329_v36   ;;  %406 = vperm.xlu2 %1472, %v332_v37  }
  0x4f   :  { %1325 = vmatmul.msk.bf16.gmra.mxu0 %vm204_vm0, %v1430_v38 }
  0x55   :  { %401 = vperm.xlu1 %1471, %v331_v39  }
  0x56   :  { %411 = vperm.xlu0 %1470, %v333_v40   ;;  %601 = vperm.xlu2 %1472, %v567_v41   ;;  %v976_v41 = vld [vmem:[%s2148_s7] sm:$0xff] }
  0x5d   :  { %611 = vperm.xlu1 %1471, %v569_v42   ;;  %v598_v42 = vld [vmem:[%s2147_s6 + $0xf8] sm:$0xff] }
  0x5e   :  { %606 = vperm.xlu0 %1470, %v568_v43   ;;  %616 = vperm.xlu2 %1472, %v570_v44   ;;  %v977_v43 = vld [vmem:[%s2148_s7 + $0x8] sm:$0xff] }
  0x5f   :  { %1326 = vmatmul.msk.bf16.gmra.mxu0 %vm204_vm0, %v1431_v45  ;;  %v979_v45 = vld [vmem:[%s2148_s7 + $0x18] sm:$0xff] }
  0x60   :  { %v1727_v56 = vpop.permute.xlu2 %124 }
  0x65   :  { %626 = vperm.xlu1 %1471, %v572_v46  }
  0x66   :  { %621 = vperm.xlu0 %1470, %v571_v47   ;;  %631 = vperm.xlu2 %1472, %v573_v48   ;;  %v978_v47 = vld [vmem:[%s2148_s7 + $0x10] sm:$0xff]  ;;  %v980_v48 = vld [vmem:[%s2148_s7 + $0x20] sm:$0xff] }
  0x68   :  { %v1746_v63 = vpop.permute.xlu2 %129 }
  0x6d   :  { %641 = vperm.xlu1 %1471, %v575_v49  }
  0x6e   :  { %636 = vperm.xlu0 %1470, %v574_v50   ;;  %646 = vperm.xlu2 %1472, %v576_v51  }
  0x6f   :  { %1327 = vmatmul.msk.bf16.gmra.mxu0 %vm204_vm0, %v1432_v52 }
  0x70   :  { %v1763_v6 = vpop.permute.xlu2 %104 }
  0x75   :  { %656 = vperm.xlu1 %1471, %v578_v53  }
  0x76   :  { %651 = vperm.xlu0 %1470, %v577_v54   ;;  %661 = vperm.xlu2 %1472, %v579_v55   ;;  %v982_v54 = vld [vmem:[%s2148_s7 + $0x30] sm:$0xff]  ;;  %v981_v55 = vld [vmem:[%s2148_s7 + $0x28] sm:$0xff] }
  0x77   :  { %v1743_v62 = vpop.permute.xlu1 %134 }
  0x78   :  { %v1729_v57 = vpop.permute.xlu0 %144  ;;  %v100_v16 = vpop.permute.xlu2 %99 }
  0x7d   :  { %671 = vperm.xlu1 %1471, %v581_v58   ;;  %v983_v58 = vld [vmem:[%s2148_s7 + $0x38] sm:$0xff] }
  0x7e   :  { %666 = vperm.xlu0 %1470, %v580_v59   ;;  %676 = vperm.xlu2 %1472, %v582_v60   ;;  %v985_v60 = vld [vmem:[%s2148_s7 + $0x48] sm:$0xff] }
  0x7f   :  { %1328 = vmatmul.msk.bf16.gmra.mxu0 %vm204_vm0, %v1433_v61  ;;  %v1759_v4 = vpop.permute.xlu1 %139 }
  0x80   :  { %v1748_v0 = vpop.permute.xlu0 %149  ;;  %v75_v24 = vpop.permute.xlu2 %74 }
  0x85   :  { %686 = vperm.xlu1 %1471, %v584_v1   ;;  %v984_v1 = vld [vmem:[%s2148_s7 + $0x40] sm:$0xff] }
  0x86   :  { %681 = vperm.xlu0 %1470, %v583_v2   ;;  %691 = vperm.xlu2 %1472, %v585_v3   ;;  %v986_v2 = vld [vmem:[%s2148_s7 + $0x50] sm:$0xff] }
  0x87   :  { %v1774_v11 = vpop.permute.xlu1 %119 }
  0x88   :  { %v1761_v5 = vpop.permute.xlu0 %114 }
  0x8c   :  { %v238_v10 = vpop.f32.mrf.mxu0 }
  0x8d   :  { %701 = vperm.xlu1 %1471, %v587_v7   ;;  %v239_v25 = vadd.f32 %v238_v10, %v75_v24  ;;  %v996_v24 = vld [vmem:[%s2148_s7 + $0xa0] sm:$0xff] }
  0x8e   :  { %696 = vperm.xlu0 %1470, %v586_v8   ;;  %706 = vperm.xlu2 %1472, %v588_v9  }
  0x8f   :  { %v95_v19 = vpop.permute.xlu1 %94  ;;  %v278_v29 = vmax.f32 %v239_v25, 0.0  ;;  %v998_v25 = vld [vmem:[%s2148_s7 + $0xb0] sm:$0xff] }
  0x90   :  { %v1776_v12 = vpop.permute.xlu0 %109 }
  0x94   :  { %v240_v17 = vpop.f32.mrf.mxu0 }
  0x95   :  { %716 = vperm.xlu1 %1471, %v590_v13   ;;  %v987_v13 = vld [vmem:[%s2148_s7 + $0x58] sm:$0xff] }
  0x96   :  { %711 = vperm.xlu0 %1470, %v589_v14   ;;  %721 = vperm.xlu2 %1472, %v591_v15   ;;  %v989_v14 = vld [vmem:[%s2148_s7 + $0x68] sm:$0xff]  ;;  %v991_v15 = vld [vmem:[%s2148_s7 + $0x78] sm:$0xff] }
  0x97   :  { %v90_v34 = vpop.permute.xlu1 %89 }
  0x98   :  { %v85_v18 = vpop.permute.xlu0 %84 }
  0x9c   :  { %v243_v23 = vpop.f32.mrf.mxu0 }
  0x9d   :  { %731 = vperm.xlu1 %1471, %v593_v20   ;;  %v244_v30 = vadd.f32 %v243_v23, %v85_v18  ;;  %v993_v20 = vld [vmem:[%s2148_s7 + $0x88] sm:$0xff] }
  0x9e   :  { %726 = vperm.xlu0 %1470, %v592_v21   ;;  %736 = vperm.xlu2 %1472, %v594_v22   ;;  %v995_v21 = vld [vmem:[%s2148_s7 + $0x98] sm:$0xff]  ;;  %v997_v23 = vld [vmem:[%s2148_s7 + $0xa8] sm:$0xff] }
  0x9f   :  { %v280_v38 = vmax.f32 %v244_v30, 0.0 }
  0xa0   :  { %v80_v26 = vpop.permute.xlu0 %79 }
  0xa1   :  { %v241_v27 = vadd.f32 %v240_v17, %v80_v26  ;;  %v992_v17 = vld [vmem:[%s2148_s7 + $0x80] sm:$0xff] }
  0xa3   :  { %v279_v31 = vmax.f32 %v241_v27, 0.0  ;;  %v1000_v27 = vld [vmem:[%s2148_s7 + $0xc0] sm:$0xff] }
  0xa4   :  { %v245_v35 = vpop.f32.mrf.mxu0 }
  0xa5   :  { %v246_v36 = vadd.f32 %v245_v35, %v90_v34  ;;  %746 = vperm.xlu1 %1471, %v596_v28   ;;  %v1805_v37 = vpack.c.bf16 %v279_v31, %v278_v29  ;;  %v999_v28 = vld [vmem:[%s2148_s7 + $0xb8] sm:$0xff]  ;;  %v1001_v29 = vld [vmem:[%s2148_s7 + $0xc8] sm:$0xff]  ;;  %v1006_v35 = vld [vmem:[%s2148_s7 + $0xf0] sm:$0xff] }
  0xa6   :  { %741 = vperm.xlu0 %1470, %v595_v32   ;;  %751 = vperm.xlu2 %1472, %v597_v33   ;;  %v1003_v31 = vld [vmem:[%s2148_s7 + $0xd8] sm:$0xff]  ;;  %v1002_v32 = vld [vmem:[%s2148_s7 + $0xd0] sm:$0xff]  ;;  %v1004_v33 = vld [vmem:[%s2148_s7 + $0xe0] sm:$0xff] }
  0xa7   :  { %v281_v39 = vmax.f32 %v246_v36, 0.0  ;;  %v1005_v36 = vld [vmem:[%s2148_s7 + $0xe8] sm:$0xff] }
  0xa9   :  { %v1807_v40 = vpack.c.bf16 %v281_v39, %v280_v38  ;;  %v1007_v38 = vld [vmem:[%s2148_s7 + $0xf8] sm:$0xff] }
  0xac   :  { %v248_v44 = vpop.f32.mrf.mxu0 }
  0xad   :  { %1010 = vperm.xlu1 %1471, %v976_v41   ;;  %v249_v46 = vadd.f32 %v248_v44, %v95_v19  ;;  %v994_v19 = vld [vmem:[%s2148_s7 + $0x90] sm:$0xff] }
  0xae   :  { %756 = vperm.xlu0 %1470, %v598_v42   ;;  %1015 = vperm.xlu2 %1472, %v977_v43   ;;  %v1237_v42 = vld [vmem:[#allocation2] sm:$0x1] }
  0xaf   :  { %v282_v51 = vmax.f32 %v249_v46, 0.0 }
  0xb4   :  { %v250_v49 = vpop.f32.mrf.mxu0 }
  0xb5   :  { %v251_v50 = vadd.f32 %v250_v49, %v100_v16  ;;  %1025 = vperm.xlu1 %1471, %v979_v45   ;;  %v990_v16 = vld [vmem:[%s2148_s7 + $0x70] sm:$0xff] }
  0xb6   :  { %1020 = vperm.xlu0 %1470, %v978_v47   ;;  %1030 = vperm.xlu2 %1472, %v980_v48  }
  0xb7   :  { %v283_v52 = vmax.f32 %v251_v50, 0.0 }
  0xb9   :  { %v1827_v53 = vpack.c.bf16 %v283_v52, %v282_v51 }
  0xbc   :  { %v253_v59 = vpop.f32.mrf.mxu0 }
  0xbd   :  { %1040 = vperm.xlu1 %1471, %v982_v54   ;;  %v254_v61 = vadd.f32 %v253_v59, %v1763_v6  ;;  %v988_v6 = vld [vmem:[%s2148_s7 + $0x60] sm:$0xff] }
  0xbe   :  { %1035 = vperm.xlu0 %1470, %v981_v55   ;;  %1045 = vperm.xlu2 %1472, %v983_v58  }
  0xbf   :  { %v284_v8 = vmax.f32 %v254_v61, 0.0  ;;  %v1442_v61 = vld [vmem:[%s2144_s3 + $0x30] sm:$0xff] }
  0xc4   :  { %v255_v3 = vpop.f32.mrf.mxu0 }
  0xc5   :  { %v256_v7 = vadd.f32 %v255_v3, %v1776_v12  ;;  %1055 = vperm.xlu1 %1471, %v985_v60  }
  0xc6   :  { %1050 = vperm.xlu0 %1470, %v984_v1   ;;  %1060 = vperm.xlu2 %1472, %v986_v2   ;;  %v1443_v1 = vld [vmem:[%s2144_s3 + $0x38] sm:$0xff]  ;;  %v337_v2 = vpop.permute.xlu1 %336 }
  0xc7   :  { %v285_v9 = vmax.f32 %v256_v7, 0.0 }
  0xc9   :  { %v1849_v10 = vpack.c.bf16 %v285_v9, %v284_v8  ;;  %v342_v8 = vpop.permute.xlu2 %341 }
  0xcc   :  { %v1860_v12 = vpop.f32.mrf.mxu0 }
  0xcd   :  { %1070 = vperm.xlu1 %1471, %v988_v6  }
  0xce   :  { %1065 = vperm.xlu0 %1470, %v987_v13   ;;  %1075 = vperm.xlu2 %1472, %v989_v14  }
  0xd4   :  { %v260_v18 = vpop.f32.mrf.mxu0 }
  0xd5   :  { %1085 = vperm.xlu1 %1471, %v991_v15   ;;  %v347_v15 = vpop.permute.xlu0 %346 }
  0xd6   :  { %1080 = vperm.xlu0 %1470, %v990_v16   ;;  %1090 = vperm.xlu2 %1472, %v992_v17   ;;  %v352_v17 = vpop.permute.xlu1 %351 }
  0xdc   :  { %v263_v22 = vpop.f32.mrf.mxu0 }
  0xdd   :  { %1100 = vperm.xlu1 %1471, %v994_v19   ;;  %v264_v52 = vadd.f32 %v263_v22, %v1727_v56  ;;  %v1436_v56 = vld [vmem:[%s2144_s3] sm:$0xff] }
  0xde   :  { %1095 = vperm.xlu0 %1470, %v993_v20   ;;  %1105 = vperm.xlu2 %1472, %v995_v21  }
  0xe4   :  { %v265_v26 = vpop.f32.mrf.mxu0 }
  0xe5   :  { %1115 = vperm.xlu1 %1471, %v997_v23   ;;  %v266_v49 = vadd.f32 %v265_v26, %v1746_v63  ;;  %v362_v26 = vpop.permute.xlu0 %361 }
  0xe6   :  { %1110 = vperm.xlu0 %1470, %v996_v24   ;;  %1120 = vperm.xlu2 %1472, %v998_v25   ;;  %v357_v24 = vpop.permute.xlu2 %356 }
  0xe7   :  { %v289_v55 = vmax.f32 %v266_v49, 0.0 }
  0xec   :  { %v268_v30 = vpop.f32.mrf.mxu0 }
  0xed   :  { %1130 = vperm.xlu1 %1471, %v1000_v27   ;;  %v269_v46 = vadd.f32 %v268_v30, %v1743_v62  ;;  %v377_v49 = vpop.permute.xlu0 %376 }
  0xee   :  { %1125 = vperm.xlu0 %1470, %v999_v28   ;;  %1135 = vperm.xlu2 %1472, %v1001_v29  }
  0xef   :  { %v290_v54 = vmax.f32 %v269_v46, 0.0 }
  0xf4   :  { %v270_v34 = vpop.f32.mrf.mxu0 }
  0xf5   :  { %1145 = vperm.xlu1 %1471, %v1003_v31   ;;  %v271_v44 = vadd.f32 %v270_v34, %v1759_v4  ;;  %v288_v4 = vmax.f32 %v264_v52, 0.0 }
  0xf6   :  { %1140 = vperm.xlu0 %1470, %v1002_v32   ;;  %1150 = vperm.xlu2 %1472, %v1004_v33   ;;  %v367_v33 = vpop.permute.xlu1 %366 }
  0xf7   :  { %v291_v50 = vmax.f32 %v271_v44, 0.0  ;;  %v315_v59 = vpack.c.bf16 %v289_v55, %v288_v4 }
  0xf9   :  { %v316_v58 = vpack.c.bf16 %v291_v50, %v290_v54  ;;  %v392_v54 = vpop.permute.xlu0 %391 }
  0xfc   :  { %v273_v39 = vpop.f32.mrf.mxu0 }
  0xfd   :  { %1160 = vperm.xlu1 %1471, %v1006_v35   ;;  %v274_v41 = vadd.f32 %v273_v39, %v1729_v57  ;;  %v261_v57 = vadd.f32 %v260_v18, %v1774_v11  ;;  %v1438_v11 = vld [vmem:[%s2144_s3 + $0x10] sm:$0xff]  ;;  %v372_v35 = vpop.permute.xlu2 %371 }
  0xfe   :  { %1155 = vperm.xlu0 %1470, %v1005_v36   ;;  %1165 = vperm.xlu2 %1472, %v1007_v38  }
  0xff   :  { %v292_v47 = vmax.f32 %v274_v41, 0.0  ;;  %v287_v62 = vmax.f32 %v261_v57, 0.0 }
 0x101   :  { %v412_v4 = vpop.permute.xlu0 %411 }
 0x104   :  { %v275_v43 = vpop.f32.mrf.mxu0 }
 0x105   :  { %v276_v45 = vadd.f32 %v275_v43, %v1748_v0  ;;  %v259_v0 = vadd.f32 %v1860_v12, %v1761_v5  ;;  %v1437_v5 = vld [vmem:[%s2144_s3 + $0x8] sm:$0xff] }
 0x106   :  { %1240 = vperm.xlu0 %1470, %v1237_v42  }
 0x107   :  { %v293_v48 = vmax.f32 %v276_v45, 0.0  ;;  %v286_v60 = vmax.f32 %v259_v0, 0.0 }
 0x109   :  { %v317_v51 = vpack.c.bf16 %v293_v48, %v292_v47  ;;  %v314_v63 = vpack.c.bf16 %v287_v62, %v286_v60  ;;  %v382_v48 = vpop.permute.xlu1 %381 }
 0x10b   :  { %462 = vmatpush.bf16.msra.mxu1 %v317_v51  ;;  %v387_v51 = vpop.permute.xlu2 %386 }
 0x10f   :  { %463 = vmatpush.bf16.msra.mxu1 %v316_v58 }
 0x111   :  { %v397_v52 = vpop.permute.xlu1 %396 }
 0x113   :  { %464 = vmatpush.bf16.msra.mxu1 %v315_v59  ;;  %v407_v55 = vpop.permute.xlu2 %406 }
 0x117   :  { %465 = vmatpush.bf16.msra.mxu1 %v314_v63 }
 0x119   :  { %v402_v58 = vpop.permute.xlu1 %401 }
 0x11b   :  { %466 = vmatpush.bf16.msra.mxu1 %v1849_v10 }
 0x11f   :  { %467 = vmatpush.bf16.msra.mxu1 %v1827_v53  ;;  %v1441_v53 = vld [vmem:[%s2144_s3 + $0x28] sm:$0xff] }
 0x123   :  { %468 = vmatpush.bf16.msra.mxu1 %v1807_v40  ;;  %v1439_v40 = vld [vmem:[%s2144_s3 + $0x18] sm:$0xff] }
 0x127   :  { %469 = vmatpush.bf16.msra.mxu1 %v1805_v37  ;;  %v1440_v37 = vld [vmem:[%s2144_s3 + $0x20] sm:$0xff] }
 0x12a   :  { %470 = vmatmul.bf16.vlgmr.msra.gmra.mxu1 %v1436_v56 }
 0x13a   :  { %475 = vmatmul.bf16.gmra.mxu1 %v1437_v5 }
 0x14a   :  { %480 = vmatmul.bf16.gmra.mxu1 %v1438_v11 }
 0x15a   :  { %485 = vmatmul.bf16.gmra.mxu1 %v1439_v40 }
 0x16a   :  { %490 = vmatmul.bf16.gmra.mxu1 %v1440_v37 }
 0x17a   :  { %495 = vmatmul.bf16.gmra.mxu1 %v1441_v53 }
 0x18a   :  { %500 = vmatmul.bf16.gmra.mxu1 %v1442_v61 }
 0x19a   :  { %505 = vmatmul.bf16.gmra.mxu1 %v1443_v1 }
 0x1a7   :  { %v471_v3 = vpop.f32.mrf.mxu1 }
 0x1a8   :  { %v472_v7 = vadd.f32 %v471_v3, %v337_v2 }
 0x1aa   :  { %v511_v6 = vmax.f32 %v472_v7, 0.0 }
 0x1af   :  { %v473_v9 = vpop.f32.mrf.mxu1 }
 0x1b0   :  { %v474_v10 = vadd.f32 %v473_v9, %v342_v8 }
 0x1b2   :  { %v512_v13 = vmax.f32 %v474_v10, 0.0 }
 0x1b4   :  { %v1953_v14 = vpack.c.bf16 %v512_v13, %v511_v6 }
 0x1b7   :  { %v476_v12 = vpop.f32.mrf.mxu1 }
 0x1b8   :  { %v477_v16 = vadd.f32 %v476_v12, %v347_v15  ;;  %v1444_v12 = vld [vmem:[%s2146_s5] sm:$0xff] }
 0x1b9   :  { %v1452_v15 = vld [vmem:[%s2146_s5 + $0x40] sm:$0xff] }
 0x1ba   :  { %v513_v20 = vmax.f32 %v477_v16, 0.0  ;;  %v1445_v16 = vld [vmem:[%s2146_s5 + $0x8] sm:$0xff] }
 0x1bf   :  { %v478_v18 = vpop.f32.mrf.mxu1 }
 0x1c0   :  { %v479_v19 = vadd.f32 %v478_v18, %v352_v17  ;;  %v1453_v17 = vld [vmem:[%s2146_s5 + $0x48] sm:$0xff]  ;;  %v1446_v18 = vld [vmem:[%s2146_s5 + $0x10] sm:$0xff] }
 0x1c2   :  { %v514_v21 = vmax.f32 %v479_v19, 0.0  ;;  %v602_v19 = vpop.permute.xlu2 %601 }
 0x1c4   :  { %v1955_v22 = vpack.c.bf16 %v514_v21, %v513_v20  ;;  %v607_v20 = vpop.permute.xlu0 %606 }
 0x1c7   :  { %v481_v23 = vpop.f32.mrf.mxu1 }
 0x1c8   :  { %v482_v25 = vadd.f32 %v481_v23, %v357_v24  ;;  %v1447_v23 = vld [vmem:[%s2146_s5 + $0x18] sm:$0xff] }
 0x1c9   :  { %v1455_v24 = vld [vmem:[%s2146_s5 + $0x58] sm:$0xff] }
 0x1ca   :  { %v515_v29 = vmax.f32 %v482_v25, 0.0  ;;  %v1979_v21 = vpop.permute.xlu2 %616 }
 0x1cc   :  { %v1989_v25 = vpop.permute.xlu0 %621 }
 0x1cf   :  { %v483_v27 = vpop.f32.mrf.mxu1 }
 0x1d0   :  { %v484_v28 = vadd.f32 %v483_v27, %v362_v26 }
 0x1d2   :  { %v516_v30 = vmax.f32 %v484_v28, 0.0  ;;  %v1991_v26 = vpop.permute.xlu2 %631 }
 0x1d4   :  { %v561_v31 = vpack.c.bf16 %v516_v30, %v515_v29  ;;  %v1995_v28 = vpop.permute.xlu0 %636  ;;  %v1448_v29 = vld [vmem:[%s2146_s5 + $0x20] sm:$0xff] }
 0x1d5   :  { %v1456_v30 = vld [vmem:[%s2146_s5 + $0x60] sm:$0xff] }
 0x1d7   :  { %v486_v32 = vpop.f32.mrf.mxu1 }
 0x1d8   :  { %v487_v34 = vadd.f32 %v486_v32, %v367_v33 }
 0x1da   :  { %v517_v39 = vmax.f32 %v487_v34, 0.0 }
 0x1dc   :  { %v2007_v33 = vpop.permute.xlu0 %651 }
 0x1df   :  { %v488_v36 = vpop.f32.mrf.mxu1 }
 0x1e0   :  { %v489_v38 = vadd.f32 %v488_v36, %v372_v35  ;;  %v1449_v36 = vld [vmem:[%s2146_s5 + $0x28] sm:$0xff] }
 0x1e2   :  { %v518_v41 = vmax.f32 %v489_v38, 0.0  ;;  %v1457_v38 = vld [vmem:[%s2146_s5 + $0x68] sm:$0xff] }
 0x1e4   :  { %v562_v42 = vpack.c.bf16 %v518_v41, %v517_v39  ;;  %v2019_v39 = vpop.permute.xlu0 %666 }
 0x1e7   :  { %v491_v43 = vpop.f32.mrf.mxu1 }
 0x1e8   :  { %v492_v7 = vadd.f32 %v491_v43, %v377_v49 }
 0x1ea   :  { %v519_v6 = vmax.f32 %v492_v7, 0.0 }
 0x1ec   :  { %v2025_v43 = vpop.permute.xlu0 %681 }
 0x1ef   :  { %v493_v44 = vpop.f32.mrf.mxu1 }
 0x1f0   :  { %v494_v1 = vadd.f32 %v493_v44, %v382_v48  ;;  %v1450_v44 = vld [vmem:[%s2146_s5 + $0x30] sm:$0xff] }
 0x1f2   :  { %v520_v9 = vmax.f32 %v494_v1, 0.0 }
 0x1f4   :  { %v563_v13 = vpack.c.bf16 %v520_v9, %v519_v6  ;;  %v2037_v48 = vpop.permute.xlu0 %696 }
 0x1f7   :  { %v496_v45 = vpop.f32.mrf.mxu1 }
 0x1f8   :  { %v497_v53 = vadd.f32 %v496_v45, %v387_v51  ;;  %v1458_v45 = vld [vmem:[%s2146_s5 + $0x70] sm:$0xff]  ;;  %v1451_v51 = vld [vmem:[%s2146_s5 + $0x38] sm:$0xff] }
 0x1fa   :  { %v521_v8 = vmax.f32 %v497_v53, 0.0 }
 0x1ff   :  { %v498_v46 = vpop.f32.mrf.mxu1 }
 0x200   :  { %v499_v11 = vadd.f32 %v498_v46, %v392_v54  ;;  %v2049_v54 = vpop.permute.xlu0 %711 }
 0x202   :  { %v522_v2 = vmax.f32 %v499_v11, 0.0 }
 0x204   :  { %v564_v10 = vpack.c.bf16 %v522_v2, %v521_v8 }
 0x207   :  { %v501_v47 = vpop.f32.mrf.mxu1 }
 0x208   :  { %v502_v63 = vadd.f32 %v501_v47, %v397_v52  ;;  %v1459_v52 = vld [vmem:[%s2146_s5 + $0x78] sm:$0xff] }
 0x20a   :  { %v523_v61 = vmax.f32 %v502_v63, 0.0 }
 0x20f   :  { %v503_v50 = vpop.f32.mrf.mxu1 }
 0x210   :  { %v504_v59 = vadd.f32 %v503_v50, %v402_v58  ;;  %v2055_v58 = vpop.permute.xlu0 %726 }
 0x212   :  { %v524_v40 = vmax.f32 %v504_v59, 0.0 }
 0x214   :  { %v565_v3 = vpack.c.bf16 %v524_v40, %v523_v61 }
 0x217   :  { %v506_v57 = vpop.f32.mrf.mxu1 }
 0x218   :  { %v507_v0 = vadd.f32 %v506_v57, %v407_v55 }
 0x21a   :  { %v525_v56 = vmax.f32 %v507_v0, 0.0 }
 0x21f   :  { %v508_v62 = vpop.f32.mrf.mxu1 }
 0x220   :  { %v509_v60 = vadd.f32 %v508_v62, %v412_v4  ;;  %v2061_v62 = vpop.permute.xlu0 %741 }
 0x221   :  { %2153 = vst [vmem:[#allocation8_spill] sm:$0xff] %v2061_v62 }
 0x222   :  { %v526_v5 = vmax.f32 %v509_v60, 0.0 }
 0x224   :  { %v566_v37 = vpack.c.bf16 %v526_v5, %v525_v56 }
 0x226   :  { %855 = vmatpush.bf16.msra.mxu2 %v566_v37  ;;  %1460 = vmatpush.bf16.msra.mxu3 %v566_v37 }
 0x228   :  { %v2071_v61 = vpop.permute.xlu0 %756 }
 0x229   :  { %2156 = vst [vmem:[#allocation11_spill] sm:$0xff] %v2071_v61 }
 0x22a   :  { %856 = vmatpush.bf16.msra.mxu2 %v565_v3  ;;  %1461 = vmatpush.bf16.msra.mxu3 %v565_v3 }
 0x22e   :  { %857 = vmatpush.bf16.msra.mxu2 %v564_v10  ;;  %1462 = vmatpush.bf16.msra.mxu3 %v564_v10 }
 0x232   :  { %858 = vmatpush.bf16.msra.mxu2 %v563_v13  ;;  %1463 = vmatpush.bf16.msra.mxu3 %v563_v13 }
 0x236   :  { %859 = vmatpush.bf16.msra.mxu2 %v562_v42  ;;  %1464 = vmatpush.bf16.msra.mxu3 %v562_v42 }
 0x23a   :  { %860 = vmatpush.bf16.msra.mxu2 %v561_v31  ;;  %1465 = vmatpush.bf16.msra.mxu3 %v561_v31  ;;  %v2003_v31 = vpop.permute.xlu2 %646 }
 0x23e   :  { %861 = vmatpush.bf16.msra.mxu2 %v1955_v22  ;;  %1466 = vmatpush.bf16.msra.mxu3 %v1955_v22  ;;  %v1981_v22 = vpop.permute.xlu1 %611 }
 0x242   :  { %862 = vmatpush.bf16.msra.mxu2 %v1953_v14  ;;  %1467 = vmatpush.bf16.msra.mxu3 %v1953_v14  ;;  %v1454_v14 = vld [vmem:[%s2146_s5 + $0x50] sm:$0xff]  ;;  %v2009_v34 = vpop.permute.xlu2 %661  ;;  %s1504_s5 = smov [#allocation3]  }
 0x243   :  { %s1270_s12 = sshll.u32 %s1504_s5, 4  ;;  %s1271_s12 = int_to_ptr.vmem [resolvable:$true] %s1270_s12 }
 0x245   :  { %863 = vmatmul.bf16.vlgmr.msra.gmra.mxu2 %v1444_v12  ;;  %903 = vmatmul.bf16.vlgmr.msra.gmra.mxu3 %v1452_v15  ;;  %v1021_v15 = vpop.permute.xlu0 %1020 }
 0x246   :  { %v1993_v27 = vpop.permute.xlu1 %626 }
 0x24a   :  { %v2021_v41 = vpop.permute.xlu2 %676 }
 0x24e   :  { %v2005_v32 = vpop.permute.xlu1 %641 }
 0x252   :  { %v2033_v46 = vpop.permute.xlu2 %691 }
 0x255   :  { %868 = vmatmul.bf16.gmra.mxu2 %v1445_v16  ;;  %908 = vmatmul.bf16.gmra.mxu3 %v1453_v17 }
 0x256   :  { %v2011_v35 = vpop.permute.xlu1 %656 }
 0x25a   :  { %v2039_v49 = vpop.permute.xlu2 %706 }
 0x25e   :  { %v2023_v42 = vpop.permute.xlu1 %671 }
 0x262   :  { %v2051_v57 = vpop.permute.xlu2 %721 }
 0x265   :  { %873 = vmatmul.bf16.gmra.mxu2 %v1446_v18  ;;  %913 = vmatmul.bf16.gmra.mxu3 %v1454_v14 }
 0x266   :  { %v2035_v47 = vpop.permute.xlu1 %686 }
 0x26a   :  { %v2057_v0 = vpop.permute.xlu2 %736 }
 0x26b   :  { %2151 = vst [vmem:[#allocation6_spill] sm:$0xff] %v2057_v0 }
 0x26e   :  { %v2041_v50 = vpop.permute.xlu1 %701 }
 0x272   :  { %v2065_v63 = vpop.permute.xlu2 %751 }
 0x273   :  { %2154 = vst [vmem:[#allocation9_spill] sm:$0xff] %v2065_v63 }
 0x275   :  { %878 = vmatmul.bf16.gmra.mxu2 %v1447_v23  ;;  %918 = vmatmul.bf16.gmra.mxu3 %v1455_v24 }
 0x276   :  { %v2053_v55 = vpop.permute.xlu1 %716 }
 0x27a   :  { %v1016_v2 = vpop.permute.xlu2 %1015 }
 0x27e   :  { %v2059_v4 = vpop.permute.xlu1 %731 }
 0x27f   :  { %2152 = vst [vmem:[#allocation7_spill] sm:$0xff] %v2059_v4 }
 0x285   :  { %883 = vmatmul.bf16.gmra.mxu2 %v1448_v29  ;;  %923 = vmatmul.bf16.gmra.mxu3 %v1456_v30 }
 0x286   :  { %v2067_v56 = vpop.permute.xlu1 %746 }
 0x287   :  { %2155 = vst [vmem:[#allocation10_spill] sm:$0xff] %v2067_v56 }
 0x28e   :  { %v1011_v3 = vpop.permute.xlu1 %1010 }
 0x295   :  { %888 = vmatmul.bf16.gmra.mxu2 %v1449_v36  ;;  %928 = vmatmul.bf16.gmra.mxu3 %v1457_v38 }
 0x296   :  { %v1026_v23 = vpop.permute.xlu1 %1025 }
 0x2a5   :  { %893 = vmatmul.bf16.gmra.mxu2 %v1450_v44  ;;  %933 = vmatmul.bf16.gmra.mxu3 %v1458_v45  ;;  %v1031_v44 = vpop.permute.xlu2 %1030 }
 0x2b5   :  { %898 = vmatmul.bf16.gmra.mxu2 %v1451_v51  ;;  %938 = vmatmul.bf16.gmra.mxu3 %v1459_v52 }
 0x2c8   :  { %v864_v59 = vpop.f32.mrf.mxu2  ;;  %v2063_v60 = vpop.f32.mrf.mxu3 }
 0x2c9   :  { %v865_v5 = vadd.f32 %v864_v59, %v602_v19 }
 0x2cb   :  { %v944_v37 = vmax.f32 %v865_v5, 0.0 }
 0x2cd   :  { %v1168_v7 = vmul.f32 %v1011_v3, %v944_v37  ;;  %v1041_v3 = vpop.permute.xlu1 %1040 }
 0x2d0   :  { %v866_v11 = vpop.f32.mrf.mxu2  ;;  %v2069_v40 = vpop.f32.mrf.mxu3 }
 0x2d1   :  { %v867_v53 = vadd.f32 %v866_v11, %v607_v20 }
 0x2d3   :  { %v945_v1 = vmax.f32 %v867_v53, 0.0 }
 0x2d5   :  { %v1169_v8 = vmul.f32 %v1016_v2, %v945_v1  ;;  %v1036_v1 = vpop.permute.xlu0 %1035 }
 0x2d7   :  { %v1200_v9 = vadd.f32 %v1169_v8, %v1168_v7 }
 0x2d8   :  { %v869_v10 = vpop.f32.mrf.mxu2  ;;  %v2073_v6 = vpop.f32.mrf.mxu3 }
 0x2d9   :  { %v870_v13 = vadd.f32 %v869_v10, %v1981_v22  ;;  %v1056_v10 = vpop.permute.xlu1 %1055 }
 0x2db   :  { %v946_v12 = vmax.f32 %v870_v13, 0.0 }
 0x2dd   :  { %v1170_v16 = vmul.f32 %v1021_v15, %v946_v12 }
 0x2df   :  { %v1201_v17 = vadd.f32 %v1200_v9, %v1170_v16  ;;  %v1051_v9 = vpop.permute.xlu0 %1050 }
 0x2e0   :  { %v871_v18 = vpop.f32.mrf.mxu2  ;;  %v2077_v19 = vpop.f32.mrf.mxu3 }
 0x2e1   :  { %v872_v14 = vadd.f32 %v871_v18, %v1979_v21 }
 0x2e3   :  { %v947_v20 = vmax.f32 %v872_v14, 0.0 }
 0x2e5   :  { %v1171_v24 = vmul.f32 %v1026_v23, %v947_v20 }
 0x2e7   :  { %v1202_v29 = vadd.f32 %v1201_v17, %v1171_v24  ;;  %v1066_v16 = vpop.permute.xlu0 %1065  ;;  %v1071_v17 = vpop.permute.xlu1 %1070 }
 0x2e8   :  { %v874_v30 = vpop.f32.mrf.mxu2  ;;  %v2080_v45 = vpop.f32.mrf.mxu3 }
 0x2e9   :  { %v875_v36 = vadd.f32 %v874_v30, %v1989_v25  ;;  %v1046_v25 = vpop.permute.xlu2 %1045 }
 0x2eb   :  { %v948_v38 = vmax.f32 %v875_v36, 0.0 }
 0x2ed   :  { %v1172_v22 = vmul.f32 %v1031_v44, %v948_v38 }
 0x2ef   :  { %v1203_v51 = vadd.f32 %v1202_v29, %v1172_v22  ;;  %v1081_v44 = vpop.permute.xlu0 %1080  ;;  %v1086_v56 = vpop.permute.xlu1 %1085 }
 0x2f0   :  { %v876_v52 = vpop.f32.mrf.mxu2  ;;  %v2082_v59 = vpop.f32.mrf.mxu3 }
 0x2f1   :  { %v1061_v13 = vpop.permute.xlu2 %1060  ;;  %v877_v14 = vadd.f32 %v876_v52, %v1993_v27 }
 0x2f3   :  { %v949_v29 = vmax.f32 %v877_v14, 0.0 }
 0x2f5   :  { %v1173_v22 = vmul.f32 %v1036_v1, %v949_v29 }
 0x2f7   :  { %v1096_v29 = vpop.permute.xlu0 %1095 }
 0x2f8   :  { %v879_v5 = vpop.f32.mrf.mxu2  ;;  %v2084_v21 = vpop.f32.mrf.mxu3 }
 0x2f9   :  { %v1076_v18 = vpop.permute.xlu2 %1075  ;;  %v880_v24 = vadd.f32 %v879_v5, %v1991_v26  ;;  %v1204_v26 = vadd.f32 %v1203_v51, %v1173_v22 }
 0x2fb   :  { %v950_v36 = vmax.f32 %v880_v24, 0.0 }
 0x2fd   :  { %v1174_v0 = vmul.f32 %v1041_v3, %v950_v36 }
 0x300   :  { %v881_v11 = vpop.f32.mrf.mxu2  ;;  %v2086_v53 = vpop.f32.mrf.mxu3 }
 0x301   :  { %v882_v30 = vadd.f32 %v881_v11, %v1995_v28 }
 0x303   :  { %v951_v61 = vmax.f32 %v882_v30, 0.0 }
 0x305   :  { %v1175_v5 = vmul.f32 %v1046_v25, %v951_v61 }
 0x308   :  { %v884_v37 = vpop.f32.mrf.mxu2  ;;  %v2088_v7 = vpop.f32.mrf.mxu3 }
 0x309   :  { %v885_v38 = vadd.f32 %v884_v37, %v2005_v32  ;;  %v1205_v32 = vadd.f32 %v1204_v26, %v1174_v0  ;;  %v910_v26 = vadd.f32 %v2073_v6, %v2033_v46  ;;  %v917_v46 = vadd.f32 %v2082_v59, %v2039_v49 }
 0x30a   :  { %v925_v49 = vadd.f32 %v2088_v7, %v2051_v57 }
 0x30b   :  { %v952_v27 = vmax.f32 %v885_v38, 0.0 }
 0x30d   :  { %v1176_v37 = vmul.f32 %v1051_v9, %v952_v27  ;;  %v1111_v27 = vpop.permute.xlu0 %1110 }
 0x310   :  { %v886_v2 = vpop.f32.mrf.mxu2  ;;  %v2090_v12 = vpop.f32.mrf.mxu3 }
 0x311   :  { %v887_v63 = vadd.f32 %v886_v2, %v2003_v31  ;;  %v1206_v31 = vadd.f32 %v1205_v32, %v1175_v5 }
 0x313   :  { %v953_v28 = vmax.f32 %v887_v63, 0.0  ;;  %v1101_v63 = vpop.permute.xlu1 %1100 }
 0x315   :  { %v1177_v2 = vmul.f32 %v1056_v10, %v953_v28 }
 0x318   :  { %v889_v8 = vpop.f32.mrf.mxu2  ;;  %v2093_v20 = vpop.f32.mrf.mxu3 }
 0x319   :  { %2157 = vst [vmem:[#allocation12_spill] sm:$0xff] %v2093_v20  ;;  %v890_v52 = vadd.f32 %v889_v8, %v2007_v33  ;;  %v1091_v20 = vpop.permute.xlu2 %1090  ;;  %v1207_v8 = vadd.f32 %v1206_v31, %v1176_v37 }
 0x31b   :  { %v954_v1 = vmax.f32 %v890_v52, 0.0  ;;  %v1208_v51 = vadd.f32 %v1207_v8, %v1177_v2  ;;  %v1116_v28 = vpop.permute.xlu1 %1115 }
 0x31d   :  { %v1178_v30 = vmul.f32 %v1061_v13, %v954_v1  ;;  %v907_v13 = vadd.f32 %v2069_v40, %v2035_v47 }
 0x320   :  { %v891_v15 = vpop.f32.mrf.mxu2  ;;  %v2100_v4 = vpop.f32.mrf.mxu3 }
 0x321   :  { %v892_v11 = vadd.f32 %v891_v15, %v2011_v35  ;;  %v1106_v25 = vpop.permute.xlu2 %1105 }
 0x323   :  { %v955_v24 = vmax.f32 %v892_v11, 0.0  ;;  %v961_v11 = vmax.f32 %v907_v13, 0.0 }
 0x325   :  { %v1179_v35 = vmul.f32 %v1066_v16, %v955_v24  ;;  %v1185_v1 = vmul.f32 %v1096_v29, %v961_v11 }
 0x328   :  { %v894_v23 = vpop.f32.mrf.mxu2  ;;  %v2106_v9 = vpop.f32.mrf.mxu3 }
 0x329   :  { %v895_v14 = vadd.f32 %v894_v23, %v2009_v34  ;;  %v1209_v34 = vadd.f32 %v1208_v51, %v1178_v30  ;;  %v1121_v32 = vpop.permute.xlu2 %1120  ;;  %v968_v51 = vmax.f32 %v925_v49, 0.0 }
 0x32b   :  { %v956_v36 = vmax.f32 %v895_v14, 0.0 }
 0x32d   :  { %v1180_v15 = vmul.f32 %v1071_v17, %v956_v36 }
 0x330   :  { %v896_v62 = vpop.f32.mrf.mxu2  ;;  %v936_v47 = vpop.f32.mrf.mxu3 }
 0x331   :  { %v897_v3 = vadd.f32 %v896_v62, %v2019_v39  ;;  %v905_v39 = vadd.f32 %v2063_v60, %v2025_v43  ;;  %v1210_v62 = vadd.f32 %v1209_v34, %v1179_v35  ;;  %v912_v43 = vadd.f32 %v2077_v19, %v2037_v48  ;;  %v1126_v19 = vpop.permute.xlu0 %1125  ;;  %v1136_v8 = vpop.permute.xlu2 %1135  ;;  %v2158_v35 = vld [vmem:[#allocation7_spill] sm:$0xff] }
 0x332   :  { %v920_v48 = vadd.f32 %v2084_v21, %v2049_v54  ;;  %v927_v54 = vadd.f32 %v2090_v12, %v2055_v58 }
 0x333   :  { %v957_v0 = vmax.f32 %v897_v3, 0.0  ;;  %v960_v52 = vmax.f32 %v905_v39, 0.0  ;;  %v963_v14 = vmax.f32 %v912_v43, 0.0  ;;  %v922_v3 = vadd.f32 %v2086_v53, %v2053_v55  ;;  %v2159_v55 = vld [vmem:[#allocation12_spill] sm:$0xff] }
 0x334   :  { %v930_v53 = vadd.f32 %v2159_v55, %v2158_v35  ;;  %v969_v34 = vmax.f32 %v927_v54, 0.0 }
 0x335   :  { %v1181_v23 = vmul.f32 %v1076_v18, %v957_v0  ;;  %v1184_v40 = vmul.f32 %v1091_v20, %v960_v52  ;;  %v1187_v24 = vmul.f32 %v1106_v25, %v963_v14  ;;  %v965_v20 = vmax.f32 %v917_v46, 0.0 }
 0x336   :  { %v1193_v13 = vmul.f32 %v1136_v8, %v969_v34 }
 0x337   :  { %v1189_v36 = vmul.f32 %v1116_v28, %v965_v20  ;;  %v2163_v28 = vld [vmem:[#allocation9_spill] sm:$0xff] }
 0x338   :  { %v899_v33 = vpop.f32.mrf.mxu2  ;;  %v939_v30 = vpop.f32.mrf.mxu3 }
 0x339   :  { %v900_v61 = vadd.f32 %v899_v33, %v2023_v42  ;;  %v1211_v42 = vadd.f32 %v1210_v62, %v1180_v15  ;;  %v966_v33 = vmax.f32 %v920_v48, 0.0  ;;  %v2160_v15 = vld [vmem:[#allocation6_spill] sm:$0xff]  ;;  %v970_v62 = vmax.f32 %v930_v53, 0.0  ;;  %v1151_v52 = vpop.permute.xlu2 %1150 }
 0x33a   :  { %v932_v57 = vadd.f32 %v2100_v4, %v2160_v15  ;;  %v940_v4 = vadd.f32 %v939_v30, %v2163_v28 }
 0x33b   :  { %v958_v10 = vmax.f32 %v900_v61, 0.0  ;;  %v1212_v17 = vadd.f32 %v1211_v42, %v1181_v23  ;;  %v967_v61 = vmax.f32 %v922_v3, 0.0  ;;  %v2161_v23 = vld [vmem:[#allocation8_spill] sm:$0xff] }
 0x33c   :  { %v971_v42 = vmax.f32 %v932_v57, 0.0 }
 0x33d   :  { %v1182_v22 = vmul.f32 %v1081_v44, %v958_v10  ;;  %v962_v44 = vmax.f32 %v910_v26, 0.0  ;;  %v1191_v25 = vmul.f32 %v1126_v19, %v967_v61  ;;  %v1141_v10 = vpop.permute.xlu0 %1140 }
 0x33f   :  { %v1213_v60 = vadd.f32 %v1212_v17, %v1182_v22  ;;  %v1186_v31 = vmul.f32 %v1101_v63, %v962_v44  ;;  %v1190_v63 = vmul.f32 %v1121_v32, %v966_v33  ;;  %v2162_v22 = vld [vmem:[#allocation10_spill] sm:$0xff]  ;;  %v1194_v17 = vmul.f32 %v1141_v10, %v970_v62 }
 0x340   :  { %v901_v38 = vpop.f32.mrf.mxu2  ;;  %v941_v26 = vpop.f32.mrf.mxu3  ;;  %v974_v44 = vmax.f32 %v940_v4, 0.0 }
 0x341   :  { %v902_v16 = vadd.f32 %v901_v38, %v2021_v41  ;;  %v915_v41 = vadd.f32 %v2080_v45, %v2041_v50  ;;  %v1131_v45 = vpop.permute.xlu1 %1130  ;;  %v935_v38 = vadd.f32 %v2106_v9, %v2161_v23 }
 0x342   :  { %v1192_v39 = vmul.f32 %v1131_v45, %v968_v51 }
 0x343   :  { %v959_v5 = vmax.f32 %v902_v16, 0.0  ;;  %v964_v2 = vmax.f32 %v915_v41, 0.0  ;;  %v937_v16 = vadd.f32 %v936_v47, %v2162_v22 }
 0x345   :  { %v1183_v18 = vmul.f32 %v1086_v56, %v959_v5  ;;  %v1188_v29 = vmul.f32 %v1111_v27, %v964_v2  ;;  %v972_v5 = vmax.f32 %v935_v38, 0.0  ;;  %v1166_v2 = vpop.permute.xlu2 %1165 }
 0x347   :  { %v1214_v37 = vadd.f32 %v1213_v60, %v1183_v18  ;;  %v973_v60 = vmax.f32 %v937_v16, 0.0  ;;  %v2164_v18 = vld [vmem:[#allocation11_spill] sm:$0xff]  ;;  %v1196_v9 = vmul.f32 %v1151_v52, %v972_v5 }
 0x348   :  { %v942_v32 = vadd.f32 %v941_v26, %v2164_v18 }
 0x349   :  { %v1215_v6 = vadd.f32 %v1214_v37, %v1184_v40  ;;  %v1146_v12 = vpop.permute.xlu1 %1145  ;;  %v1156_v37 = vpop.permute.xlu0 %1155 }
 0x34a   :  { %v1195_v43 = vmul.f32 %v1146_v12, %v971_v42  ;;  %v975_v14 = vmax.f32 %v942_v32, 0.0 }
 0x34b   :  { %v1216_v56 = vadd.f32 %v1215_v6, %v1185_v1  ;;  %v1197_v1 = vmul.f32 %v1156_v37, %v973_v60 }
 0x34c   :  { %v1199_v48 = vmul.f32 %v1166_v2, %v975_v14 }
 0x34d   :  { %v1217_v50 = vadd.f32 %v1216_v56, %v1186_v31 }
 0x34f   :  { %v1218_v59 = vadd.f32 %v1217_v50, %v1187_v24 }
 0x351   :  { %v1219_v21 = vadd.f32 %v1218_v59, %v1188_v29  ;;  %v1161_v46 = vpop.permute.xlu1 %1160  ;;  %v1241_v45 = vpop.permute.xlu0 %1240 }
 0x352   :  { %v1198_v6 = vmul.f32 %v1161_v46, %v974_v44  ;;  %v1243_v33 = vperm.slane %v1241_v45, 0 }
 0x353   :  { %v1220_v0 = vadd.f32 %v1219_v21, %v1189_v36 }
 0x355   :  { %v1221_v7 = vadd.f32 %v1220_v0, %v1190_v63 }
 0x357   :  { %v1222_v58 = vadd.f32 %v1221_v7, %v1191_v25 }
 0x359   :  { %v1223_v27 = vadd.f32 %v1222_v58, %v1192_v39 }
 0x35b   :  { %v1224_v11 = vadd.f32 %v1223_v27, %v1193_v13 }
 0x35d   :  { %v1225_v40 = vadd.f32 %v1224_v11, %v1194_v17 }
 0x35f   :  { %v1226_v41 = vadd.f32 %v1225_v40, %v1195_v43 }
 0x361   :  { %v1227_v47 = vadd.f32 %v1226_v41, %v1196_v9 }
 0x363   :  { %v1228_v31 = vadd.f32 %v1227_v47, %v1197_v1 }
 0x365   :  { %v1229_v56 = vadd.f32 %v1228_v31, %v1198_v6 }
 0x367   :  { %v1230_v19 = vadd.f32 %v1229_v56, %v1199_v48 }
 0x369   :  { %v1231_v24 = vrot.slane %v1230_v19, 4 }
 0x36b   :  { %v1232_v20 = vadd.f32 %v1231_v24, %v1230_v19 }
 0x36d   :  { %v1233_v3 = vrot.slane %v1232_v20, 2 }
 0x36f   :  { %v1234_v50 = vadd.f32 %v1233_v3, %v1232_v20 }
 0x371   :  { %v1235_v29 = vrot.slane %v1234_v50, 1 }
 0x373   :  { %v1236_v49 = vadd.f32 %v1235_v29, %v1234_v50 }
 0x375   :  { %v1244_v59 = vadd.f32 %v1243_v33, %v1236_v49 }
 0x377   :  { %v1425_v8 = vmul.f32 -1.442695, %v1244_v59 }
 0x379   :  { %1473 = vpow2.f32 %v1425_v8 }
 0x37f   :  { %v1474_v30 = vpop.eup %1473 }
 0x380   :  { %v1248_v36 = vadd.f32 1.0, %v1474_v30 }
 0x382   :  { %1475 = vrcp.f32 %v1248_v36  ;;  %v1260_v63 = vand.u32 2147483648, %v1248_v36  ;;  %v1258_v35 = vand.u32 2147483647, %v1248_v36  ;;  %vm1254_vm2 = vweird.f32 %v1248_v36 }
 0x384   :  { %v1261_v53 = vor.u32 1.1754944e-38, %v1260_v63  ;;  %vm1259_vm4 = vcmp.eq.f32.partialorder %v1258_v35, 8.507059e+37 }
 0x388   :  { %v1476_v61 = vpop.eup %1475 }
 0x389   :  { %v1250_v54 = vmul.f32 %v1476_v61, %v1248_v36  ;;  %vm1255_vm1 = vweird.f32 %v1476_v61 }
 0x38a   :  { %vm1256_vm3 = vmor %vm1254_vm2, %vm1255_vm1 }
 0x38b   :  { %v1251_v21 = vsub.f32 1.0, %v1250_v54 }
 0x38d   :  { %v1252_v51 = vmul.f32 %v1476_v61, %v1251_v21 }
 0x38f   :  { %v1253_v55 = vadd.f32 %v1476_v61, %v1252_v51 }
 0x391   :  { %v1257_v0 = vsel %vm1256_vm3, %v1476_v61, %v1253_v55 }
 0x392   :  { %v1262_v25 = vsel %vm1259_vm4, %v1261_v53, %v1257_v0 }
 0x393   :  { %1264 = vst [vmem:[#allocation3] sm:$0x1] %v1262_v25 }
 0x394   :  { %1275 = dma.vmem_to_hbm [thread:$0]  %s1271_s12, 16, %s1273_s2, [#allocation4]  }
 0x395   :  { %1501 = dma.done.wait [#allocation4], 16  }
 0x396   :  { %1502 = vsyncadd [#allocation4], 4294967280 }
 0x397   :  { %1280 = vsyncpa [#allocation4], 1 }

</bundles_post_ra>
